<compile_context>
chip_gen: v7x
topology: tpu7x:2x2x1
jax: 0.10.0
libtpu: 0.0.40
codegen_flags: <defaults>
</compile_context>

<pallas_src>
import re

import jax
import jax.numpy as jnp
from jax.experimental import pallas as pl
from jax.experimental.pallas import tpu as pltpu

LANES = 128


def _round_up(x, m):
    return (x + m - 1) // m * m


def _tpu_generation():
    """Best-effort TPU generation (5/6/7...); 0 if unknown.  Tuning only."""
    try:
        kind = jax.devices()[0].device_kind.lower()
    except Exception:
        return 0
    m = re.search(r"(\d+)", kind)
    return int(m.group(1)) if m else 0


# ----------------------------------------------------------------------------
# Kernel 1: learnable scalar multiply (CenterMask2 `Scale`)
# ----------------------------------------------------------------------------
def _scale_kernel(scale_ref, x_ref, o_ref):
    # scale_ref: SMEM (1,) float32 parameter
    # x_ref:     VMEM input tile
    # o_ref:     VMEM output tile (promoted dtype)
    s = scale_ref[0].astype(o_ref.dtype)               # hoisted scalar read
    o_ref[...] = x_ref[...].astype(o_ref.dtype) * s


def _scale_tiling(gen, out_itemsize):
    """(target block elements sized by OUTPUT bytes, vmem_limit_bytes)."""
    if gen >= 7:
        # v7x: ~3.2 TB/s per-TC HBM -> 2 MiB blocks stream in ~1.2 us, so the
        # ~0.35 us/step overhead is ~20%; 4 MiB output blocks cut it to ~10%.
        # 2x(in)+2x(out) double buffers stay well under the 32 MiB scoped /
        # 64 MiB physical VMEM.
        return (4 * 1024 * 1024) // out_itemsize, 32 * 1024 * 1024
    if gen == 6:
        # v6e: 1.4 TB/s HBM, 128 MiB physical VMEM -> 4 MiB blocks are a small
        # free win; raise the scoped limit for headroom.
        return (4 * 1024 * 1024) // out_itemsize, 48 * 1024 * 1024
    # v5e / unknown: 16 MiB scoped-VMEM default; keep ~2 MiB OUTPUT blocks so
    # the bf16-in / f32-out promotion path cannot blow the budget (overhead is
    # already <8% at 820 GB/s).
    return (2 * 1024 * 1024) // out_itemsize, None


def scale_forward(x, scale):
    """out = x * scale, matching PyTorch promotion (f32 param promotes bf16 x)."""
    scale = jnp.asarray(scale)
    out_dtype = jnp.result_type(x.dtype, scale.dtype)
    orig_shape = x.shape
    n = x.size
    if n == 0:
        return jnp.zeros(orig_shape, out_dtype)

    gen = _tpu_generation()
    target_elems, vmem_limit = _scale_tiling(gen, jnp.dtype(out_dtype).itemsize)
    cp = pltpu.CompilerParams(
        dimension_semantics=("parallel",),              # megacore-shardable
        vmem_limit_bytes=vmem_limit,
    )
    scale_arr = scale.astype(jnp.float32).reshape(1)
    flat = x.reshape(-1)                                # free view, no HBM traffic

    # Widest lane-dense last dim (multiple of 128) dividing n -> long unmasked
    # vst runs and fewer, bigger DMA descriptors.
    width = None
    for w in (4096, 2048, 1024, 512, 256, 128):
        if n % w == 0:
            width = w
            break

    if width is not None:
        rows = n // width
        target_rows = max(8, (target_elems // width) // 8 * 8)
        block_rows = rows if rows <= target_rows else target_rows
        if gen >= 7 and rows >= 16 and block_rows >= rows:
            # Guarantee >=2 grid steps so both v7x TensorCores get work.
            block_rows = max(8, (rows // 2) // 8 * 8)
        grid = (pl.cdiv(rows, block_rows),)
        slab = flat.reshape(rows, width)                # lane-dense [rows, 128*W]
        out = pl.pallas_call(
            _scale_kernel,
            out_shape=jax.ShapeDtypeStruct((rows, width), out_dtype),
            grid=grid,
            in_specs=[
                pl.BlockSpec(memory_space=pltpu.MemorySpace.SMEM),    # scale
                pl.BlockSpec((block_rows, width), lambda i: (i, 0)),  # x tile
            ],
            out_specs=pl.BlockSpec((block_rows, width), lambda i: (i, 0)),
            compiler_params=cp,
        )(scale_arr, slab)
        return out.reshape(orig_shape)

    # numel % 128 != 0: do NOT materialize jnp.pad + out[:n] (extra full-tensor
    # HBM round trips).  Run a (1, n) lane-major kernel; Pallas masks the
    # partial last block's stores.
    ODD_BLOCK = 64 * 1024                               # multiple of 128
    if n <= ODD_BLOCK:
        if gen >= 7 and n > 2 * LANES:
            block_cols = _round_up((n + 1) // 2, LANES)  # >=2 steps for 2 TCs
        else:
            block_cols = n                               # full dim: always legal
    else:
        block_cols = ODD_BLOCK
    grid = (pl.cdiv(n, block_cols),)
    row = flat.reshape(1, n)
    out = pl.pallas_call(
        _scale_kernel,
        out_shape=jax.ShapeDtypeStruct((1, n), out_dtype),
        grid=grid,
        in_specs=[
            pl.BlockSpec(memory_space=pltpu.MemorySpace.SMEM),
            pl.BlockSpec((1, block_cols), lambda i: (0, i)),
        ],
        out_specs=pl.BlockSpec((1, block_cols), lambda i: (0, i)),
        compiler_params=cp,
    )(scale_arr, row)
    return out.reshape(orig_shape)


class ScalePallas:
    """JAX/Pallas equivalent of the CenterMask2 Scale module."""

    def __init__(self, init_value=1.0):
        # nn.Parameter(torch.FloatTensor([init_value])) -> shape (1,), float32
        self.scale = jnp.asarray([init_value], dtype=jnp.float32)

    def __call__(self, x):
        return scale_forward(x, self.scale)


# ----------------------------------------------------------------------------
# Kernel 2: pairwise IoU (GT boxes x proposal boxes), the dense compute inside
# ROIHeads.label_and_sample_proposals.
# ----------------------------------------------------------------------------
_IOU_TILE_N = 512   # lanes per grid step over proposals


def _pairwise_iou_kernel(gt_ref, prT_ref, iou_ref):
    # gt_ref:  (M, 4)       GT boxes, xyxy
    # prT_ref: (4, TILE_N)  proposal boxes, coordinate-major
    # iou_ref: (M, TILE_N)
    m, tn = iou_ref.shape
    gt = gt_ref[...]
    # Lane-broadcast each GT coordinate ONCE (XLU has 2 ports vs 4 VALU);
    # everything below is pure VALU work on lane-dense operands.
    gx1 = jnp.broadcast_to(gt[:, 0:1], (m, tn))
    gy1 = jnp.broadcast_to(gt[:, 1:2], (m, tn))
    gx2 = jnp.broadcast_to(gt[:, 2:3], (m, tn))
    gy2 = jnp.broadcast_to(gt[:, 3:4], (m, tn))
    # Proposal side stays coordinate-major (1, tn): sublane broadcast is cheap.
    px1 = prT_ref[0:1, :]
    py1 = prT_ref[1:2, :]
    px2 = prT_ref[2:3, :]
    py2 = prT_ref[3:4, :]

    area_g = (gx2 - gx1) * (gy2 - gy1)                  # (m, tn)
    area_p = (px2 - px1) * (py2 - py1)                  # (1, tn)

    iw = jnp.maximum(jnp.minimum(gx2, px2) - jnp.maximum(gx1, px1), 0.0)
    ih = jnp.maximum(jnp.minimum(gy2, py2) - jnp.maximum(gy1, py1), 0.0)
    inter = iw * ih
    # max() guard keeps degenerate/padded boxes (union == 0) from producing
    # NaN/Inf before the select; when inter > 0, union >= inter > 0 so results
    # match the exact reference.  (pl.reciprocal(..., approx=True) is a valid
    # speedup if few-ulp error vs the 0.5/0.7 thresholds is acceptable.)
    union = jnp.maximum(area_g + area_p - inter, 1e-20)
    iou_ref[...] = jnp.where(inter > 0.0, inter / union, 0.0)


def pairwise_iou_batched(gt_boxes, proposal_boxes):
    """IoU (B, M, N) between GT (B, M, 4) and proposals (B, N, 4), xyxy."""
    B, M, _ = gt_boxes.shape
    _, N, _ = proposal_boxes.shape
    # (8,128)-aligned output blocks: unmasked stores, clean vreg occupancy.
    m_pad = _round_up(max(M, 1), 8)
    tile_n = min(_IOU_TILE_N, _round_up(max(N, 1), LANES))
    n_pad = _round_up(max(N, 1), tile_n)
    gt = jnp.pad(gt_boxes.astype(jnp.float32), ((0, 0), (0, m_pad - M), (0, 0)))
    pr = jnp.pad(proposal_boxes.astype(jnp.float32),
                 ((0, 0), (0, n_pad - N), (0, 0)))
    prT = jnp.transpose(pr, (0, 2, 1))                  # (B, 4, n_pad)

    iou = pl.pallas_call(
        _pairwise_iou_kernel,
        out_shape=jax.ShapeDtypeStruct((B, m_pad, n_pad), jnp.float32),
        grid=(B, n_pad // tile_n),
        in_specs=[
            pl.BlockSpec((None, m_pad, 4), lambda b, j: (b, 0, 0)),
            pl.BlockSpec((None, 4, tile_n), lambda b, j: (b, 0, j)),
        ],
        out_specs=pl.BlockSpec((None, m_pad, tile_n), lambda b, j: (b, 0, j)),
        compiler_params=pltpu.CompilerParams(
            dimension_semantics=("parallel", "parallel")),
    )(gt, prT)
    return iou[:, :M, :N]


def pairwise_iou(gt_boxes, proposal_boxes):
    """IoU matrix (M, N) for one image (GT (M,4) x proposals (N,4))."""
    return pairwise_iou_batched(gt_boxes[None], proposal_boxes[None])[0]


# ----------------------------------------------------------------------------
# Reference implementations (plain JAX) for correctness checks
# ----------------------------------------------------------------------------
def _pairwise_iou_ref(a, b):
    area_a = (a[:, 2] - a[:, 0]) * (a[:, 3] - a[:, 1])
    area_b = (b[:, 2] - b[:, 0]) * (b[:, 3] - b[:, 1])
    iw = jnp.clip(jnp.minimum(a[:, None, 2], b[None, :, 2])
                  - jnp.maximum(a[:, None, 0], b[None, :, 0]), 0.0)
    ih = jnp.clip(jnp.minimum(a[:, None, 3], b[None, :, 3])
                  - jnp.maximum(a[:, None, 1], b[None, :, 1]), 0.0)
    inter = iw * ih
    union = area_a[:, None] + area_b[None, :] - inter
    return jnp.where(inter > 0.0, inter / union, 0.0)


def _rand_boxes(key, n):
    k1, k2 = jax.random.split(key)
    xy = jax.random.uniform(k1, (n, 2), minval=0.0, maxval=50.0)
    wh = jax.random.uniform(k2, (n, 2), minval=1.0, maxval=30.0)
    return jnp.concatenate([xy, xy + wh], axis=-1).astype(jnp.float32)


if __name__ == "__main__":
    key = jax.random.PRNGKey(0)
    module = ScalePallas(init_value=1.5)

    # ---- Scale: f32 NCHW feature map (lane-aligned path) ----
    x = jax.random.normal(key, (2, 4, 16, 16), dtype=jnp.float32)
    out = jax.block_until_ready(module(x))
    ref = x * module.scale[0]
    assert out.shape == x.shape and out.dtype == ref.dtype
    assert jnp.allclose(out, ref, atol=1e-6, rtol=1e-6)

    # ---- Scale: larger f32 map (multi-block pipelined grid) ----
    xl = jax.random.normal(jax.random.PRNGKey(4), (8, 32, 64, 64),
                           dtype=jnp.float32)
    outl = jax.block_until_ready(module(xl))
    assert jnp.allclose(outl, xl * module.scale[0], atol=1e-6, rtol=1e-6)

    # ---- Scale: bf16 input, numel % 128 != 0 (no-pad masked path + promotion) ----
    xb = jax.random.normal(jax.random.PRNGKey(3), (3, 5, 7, 11),
                           dtype=jnp.bfloat16)
    outb = jax.block_until_ready(module(xb))
    refb = xb.astype(jnp.float32) * module.scale[0]
    assert outb.shape == xb.shape and outb.dtype == jnp.float32
    assert jnp.allclose(outb, refb, atol=1e-6, rtol=1e-6)

    # ---- Pairwise IoU: aligned shapes ----
    gt = _rand_boxes(jax.random.PRNGKey(1), 8)          # M = 8 GT boxes
    props = _rand_boxes(jax.random.PRNGKey(2), 128)     # N = 128 proposals
    iou = jax.block_until_ready(pairwise_iou(gt, props))
    assert iou.shape == (8, 128)
    assert jnp.allclose(iou, _pairwise_iou_ref(gt, props), atol=1e-5, rtol=1e-5)

    # ---- Pairwise IoU: ragged M/N (padding + N-tiling path) ----
    gt2 = _rand_boxes(jax.random.PRNGKey(5), 13)
    props2 = _rand_boxes(jax.random.PRNGKey(6), 1000)
    iou2 = jax.block_until_ready(pairwise_iou(gt2, props2))
    assert iou2.shape == (13, 1000)
    assert jnp.allclose(iou2, _pairwise_iou_ref(gt2, props2),
                        atol=1e-5, rtol=1e-5)

    # ---- Pairwise IoU: batched over images (parallel 2-D grid) ----
    gtb = jnp.stack([_rand_boxes(jax.random.PRNGKey(7), 8),
                     _rand_boxes(jax.random.PRNGKey(8), 8)])
    prb = jnp.stack([_rand_boxes(jax.random.PRNGKey(9), 200),
                     _rand_boxes(jax.random.PRNGKey(10), 200)])
    ioub = jax.block_until_ready(pairwise_iou_batched(gtb, prb))
    assert ioub.shape == (2, 8, 200)
    for i in range(2):
        assert jnp.allclose(ioub[i], _pairwise_iou_ref(gtb[i], prb[i]),
                            atol=1e-5, rtol=1e-5)

    print("KERNEL_OK")
</pallas_src>

<mosaic_0001>
module attributes {stable_mosaic.version = 11 : i64} {
  func.func @_scale_kernel(%arg0: i32, %arg1: memref<1xf32, #tpu.memory_space<smem>>, %arg2: memref<1x2048xf32, #tpu.memory_space<vmem>>, %arg3: memref<1x2048xf32, #tpu.memory_space<vmem>>) attributes {dimension_semantics = [#tpu.dimension_semantics<parallel>], iteration_bounds = array<i64: 1>, scalar_prefetch = 0 : i64, scratch_operands = 0 : i64, tpu.core_type = #tpu.core_type<tc>, window_params = [{transform_indices = @transform_0, window_bounds = array<i64: 1>}, {transform_indices = @transform_1, window_bounds = array<i64: 1, 2048>}, {transform_indices = @transform_2, window_bounds = array<i64: 1, 2048>}]} {
    %c0 = arith.constant 0 : index
    %0 = memref.load %arg1[%c0] : memref<1xf32, #tpu.memory_space<smem>>
    %c0_0 = arith.constant 0 : index
    %c0_1 = arith.constant 0 : index
    %1 = vector.load %arg2[%c0_0, %c0_1] : memref<1x2048xf32, #tpu.memory_space<vmem>>, vector<1x2048xf32>
    %2 = vector.broadcast %0 : f32 to vector<1x2048xf32>
    %3 = arith.mulf %1, %2 : vector<1x2048xf32>
    %c0_2 = arith.constant 0 : index
    %c0_3 = arith.constant 0 : index
    %4 = vector.load %arg3[%c0_2, %c0_3] : memref<1x2048xf32, #tpu.memory_space<vmem>>, vector<1x2048xf32>
    tpu.vector_store %arg3[%c0_2, %c0_3], %3 {strides = array<i32>} : memref<1x2048xf32, #tpu.memory_space<vmem>>, vector<1x2048xf32>,
    return
  }
  func.func @transform_0(%arg0: i32) -> i32 {
    %c0_i32 = arith.constant 0 : i32
    %c0_i32_0 = arith.constant 0 : i32
    return %c0_i32 : i32
  }
  func.func @transform_1(%arg0: i32) -> (i32, i32) {
    %c0_i32 = arith.constant 0 : i32
    %c0_i32_0 = arith.constant 0 : i32
    return %arg0, %c0_i32 : i32, i32
  }
  func.func @transform_2(%arg0: i32) -> (i32, i32) {
    %c0_i32 = arith.constant 0 : i32
    %c0_i32_0 = arith.constant 0 : i32
    return %arg0, %c0_i32 : i32, i32
  }
}

</mosaic_0001>

<bundles_post_ra>
// kernel: tpu_custom_call.1
= control target key start
LH: loop header
LB: loop body
LE: loop exit
PB: predicated region body
PF: predicated region fallthrough
CT: control target
= control target key end

     0   :  { %8 = vsyncpa [#allocation4], 0  ;;  %s142_s0 = inlined_call_operand.<no memory space> [shape: f32[1], index: 0, kind: input, shape index: {}]   ;;  %s143_s1 = inlined_call_operand.hbm [shape: f32[1,2048], index: 1, kind: input, shape index: {}]   ;;  %s144_s2 = inlined_call_operand.hbm [shape: f32[1,2048], index: 2, kind: output, shape index: {}]  }
   0x1   :  { %9 = vsyncpa [#allocation5], 0  ;;  %s98_s9 = smov [#allocation3]   ;;  %s50_s13 = scalar_lea.hbm %s143_s1, 256 }
   0x2   :  { %s18_s10 = sshll.u32 %s98_s9, 4  ;;  %p51_p0 = scmp.ne.s32.totalorder %s143_s1, %s50_s13  ;;  %s19_s10 = int_to_ptr.vmem [resolvable:$true] %s18_s10 }
   0x3   :  { %p54_p1 = scmp.lt.u32.totalorder %s50_s13, %s143_s1 }
   0x5   :  { %p56_p2 = pnand %p54_p1, %p51_p0 }
   0x7   :  { %59 = shalt.err (!%p56_p2)
}
   0x8   :  { %s60_s18 = scalar_lea.vmem %s19_s10, 256  ;;  %p65_p4 = scmp.lt.s32.totalorder %s19_s10, %s19_s10 }
   0x9   :  { %p61_p3 = scmp.ne.s32.totalorder %s19_s10, %s60_s18  ;;  %p66_p5 = scmp.lt.s32.totalorder %s60_s18, %s60_s18 }
   0xb   :  { %p67_p6 = por %p66_p5, %p65_p4 }
   0xd   :  { %p68_p7 = pnand %p67_p6, %p61_p3 }
   0xf   :  { %71 = shalt.err (!%p68_p7)
}
  0x10   :  { %21 = dma.hbm_to_vmem [thread:$0]  %s143_s1, 256, %s19_s10, [#allocation4]  }
  0x11   :  { %94 = dma.done.wait [#allocation4], 256  }
  0x12   :  { %95 = vsyncadd [#allocation4], 4294967040  ;;  %v28_v0 = vstv %s142_s0  ;;  %s99_s23 = smov [#allocation6]   ;;  %v26_v1 = vld [vmem:[#allocation3] sm:$0xff]  ;;  %v27_v2 = vld [vmem:[#allocation3 + $0x8] sm:$0xff] }
  0x13   :  { %s39_s24 = sshll.u32 %s99_s23, 4  ;;  %v29_v3 = vmul.f32 %v28_v0, %v26_v1  ;;  %v30_v4 = vmul.f32 %v28_v0, %v27_v2  ;;  %s40_s24 = int_to_ptr.vmem [resolvable:$true] %s39_s24 }
  0x14   :  { %s72_s25 = scalar_lea.vmem %s40_s24, 256  ;;  %p77_p9 = scmp.lt.s32.totalorder %s40_s24, %s40_s24 }
  0x15   :  { %31 = vst [vmem:[#allocation6] sm:$0xff] %v29_v3  ;;  %32 = vst [vmem:[#allocation6 + $0x8] sm:$0xff] %v30_v4  ;;  %p73_p8 = scmp.ne.s32.totalorder %s40_s24, %s72_s25  ;;  %p78_p10 = scmp.lt.s32.totalorder %s72_s25, %s72_s25 }
  0x17   :  { %p79_p11 = por %p78_p10, %p77_p9 }
  0x19   :  { %p80_p12 = pnand %p79_p11, %p73_p8 }
  0x1b   :  { %83 = shalt.err (!%p80_p12)
}
  0x1c   :  { %s84_s0 = scalar_lea.hbm %s144_s2, 256 }
  0x1d   :  { %p85_p13 = scmp.ne.s32.totalorder %s144_s2, %s84_s0  ;;  %p88_p0 = scmp.lt.u32.totalorder %s84_s0, %s144_s2 }
  0x1f   :  { %p90_p1 = pnand %p88_p0, %p85_p13 }
  0x21   :  { %93 = shalt.err (!%p90_p1)
}
  0x22   :  { %42 = dma.vmem_to_hbm [thread:$0]  %s40_s24, 256, %s144_s2, [#allocation5]  }
  0x23   :  { %96 = dma.done.wait [#allocation5], 256  }
  0x24   :  { %97 = vsyncadd [#allocation5], 4294967040 }
  0x25   :  { %46 = vsyncpa [#allocation4], 1 }
  0x26   :  { %47 = vsyncpa [#allocation5], 1 }

</bundles_post_ra>
